<compile_context>
chip_gen: v6e
topology: v6e:2x2x1
jax: 0.10.0
libtpu: 0.0.40
codegen_flags: <defaults>
</compile_context>

<pallas_src>
import functools
import math

import jax
import jax.numpy as jnp
from jax import lax
from jax.experimental import pallas as pl
from jax.experimental.pallas import tpu as pltpu

_LANE = 128
_MAX_PACK = 16                      # cap on block-diagonal weight replication
_SQRT_2_OVER_PI = 0.7978845608028654
_INV_SQRT2 = 0.7071067811865476


def _cdiv(a, b):
    return -(-a // b)


def _round_up(x, m):
    return ((x + m - 1) // m) * m


def _min_sublane(dtype):
    # Sub-32-bit dtypes pack along sublanes: f32 -> 8, bf16 -> 16, int8/fp8 -> 32.
    return max(8, 32 // jnp.dtype(dtype).itemsize)


def _pack_factor(input_dim, emb_dim):
    """Rows packed per 128-lane slab so both feature dims become 128-multiples."""
    need_in = _LANE // math.gcd(_LANE, input_dim)
    need_emb = _LANE // math.gcd(_LANE, emb_dim)
    p = need_in * need_emb // math.gcd(need_in, need_emb)   # lcm
    return p if p <= _MAX_PACK else 1


def _block_diag(w, p):
    """(k, n) -> (p*k, p*n) block-diagonal matrix with p copies of w."""
    return jnp.kron(jnp.eye(p, dtype=w.dtype), w)


def pack_embedfc_params(w1, b1, w2, b2, *, matmul_dtype=jnp.bfloat16):
    """Build the kernel-side (kron-packed, dtype-cast) parameters ONCE.

    w1: (input_dim, emb_dim)  b1: (emb_dim,)
    w2: (emb_dim, emb_dim)    b2: (emb_dim,)
    """
    w1 = jnp.asarray(w1)
    b1 = jnp.asarray(b1)
    w2 = jnp.asarray(w2)
    b2 = jnp.asarray(b2)
    input_dim, emb_dim = w1.shape
    p = _pack_factor(input_dim, emb_dim)
    if p > 1:
        w1k, w2k = _block_diag(w1, p), _block_diag(w2, p)
        b1k, b2k = jnp.tile(b1, p), jnp.tile(b2, p)
    else:
        w1k, w2k, b1k, b2k = w1, w2, b1, b2
    return dict(
        w1=w1k.astype(matmul_dtype),
        w2=w2k.astype(matmul_dtype),
        # Biases stay f32: they are added to the f32 accumulator.
        b1=b1k.astype(jnp.float32).reshape(1, -1),
        b2=b2k.astype(jnp.float32).reshape(1, -1),
        p=p, input_dim=input_dim, emb_dim=emb_dim)


def _embedfc_kernel(x_ref, w1_ref, b1_ref, w2_ref, b2_ref, o_ref, *,
                    approximate_gelu):
    # Matmul operands in the weights' storage dtype (bf16 by default -> native
    # MXU rate); accumulation stays f32 via preferred_element_type.
    xm = x_ref[...].astype(w1_ref.dtype)
    h = jnp.dot(xm, w1_ref[...], preferred_element_type=jnp.float32)
    h = h + b1_ref[...]
    if approximate_gelu:
        # tanh-approx GELU (torch nn.GELU(approximate='tanh')): tanh executes
        # on the EUP slot, keeping the VALU free -> kernel stays HBM-bound.
        inner = _SQRT_2_OVER_PI * (h + 0.044715 * (h * h * h))
        h = 0.5 * h * (1.0 + jnp.tanh(inner))
    else:
        # Exact erf GELU (torch nn.GELU() default) -- bit-parity mode; erf is a
        # long VALU polynomial and can become the binding unit at large tiles.
        h = 0.5 * h * (1.0 + lax.erf(h * _INV_SQRT2))
    o = jnp.dot(h.astype(w2_ref.dtype), w2_ref[...],
                preferred_element_type=jnp.float32)
    o = o + b2_ref[...]
    o_ref[...] = o.astype(o_ref.dtype)


def embed_fc(x, params, *, block_rows=2048, approximate_gelu=True,
             out_dtype=None, vmem_limit_bytes=32 * 1024 * 1024):
    """EmbedFC forward: GELU(x.view(-1, input_dim) @ W1 + b1) @ W2 + b2.

    `params` comes from pack_embedfc_params (built once, reused every call).
    `block_rows` is the target number of PACKED rows per pipeline step
    (~3 MiB of x+out per step at these feature sizes with the default 2048).
    """
    p = params["p"]
    input_dim = params["input_dim"]
    emb_dim = params["emb_dim"]
    w1k, b1k, w2k, b2k = params["w1"], params["b1"], params["w2"], params["b2"]
    k_dim = p * input_dim           # kernel-visible input width
    n_dim = p * emb_dim             # kernel-visible output width

    x2d = x.reshape(-1, input_dim)
    batch = x2d.shape[0]
    if out_dtype is None:
        out_dtype = x2d.dtype

    in_b = jnp.dtype(x2d.dtype).itemsize
    out_b = jnp.dtype(out_dtype).itemsize
    w_b = jnp.dtype(w1k.dtype).itemsize
    sublane = max(_min_sublane(x2d.dtype), _min_sublane(out_dtype))

    # --- batch tiling (in packed rows) -----------------------------------
    packed_batch = _cdiv(batch, p)
    # VMEM budget: double-buffered x+out tiles + (double-buffered) resident weights.
    bytes_per_row = 2 * (k_dim * in_b + n_dim * out_b)
    weight_bytes = 2 * ((k_dim + n_dim) * n_dim * w_b + 2 * n_dim * 4)
    budget = (vmem_limit_bytes * 3) // 4
    cap = max(sublane, (budget - weight_bytes) // bytes_per_row)
    tb_target = max(sublane, min(int(block_rows), int(cap)))

    if packed_batch <= sublane:
        tb = sublane
    else:
        # >= 2 grid steps keeps both v7x TensorCores busy (no-op on v5e/v6e).
        n_steps = max(2, _cdiv(packed_batch, tb_target))
        tb = _round_up(_cdiv(packed_batch, n_steps), sublane)
    grid_len = _cdiv(packed_batch, tb)
    padded_packed = grid_len * tb
    padded = padded_packed * p

    # Pad only by the (tiny) tile remainder; skipped entirely for aligned batches.
    if padded != batch:
        x2d = jnp.pad(x2d, ((0, padded - batch), (0, 0)))
    # Same row-major bytes -- the reshape packs p consecutive logical rows per slab.
    x_packed = x2d.reshape(padded_packed, k_dim)

    cost = pl.CostEstimate(
        flops=2 * padded_packed * n_dim * (k_dim + n_dim),
        transcendentals=padded_packed * n_dim,
        bytes_accessed=(padded_packed * (k_dim * in_b + n_dim * out_b)
                        + (k_dim + n_dim) * n_dim * w_b + 2 * n_dim * 4),
    )

    kernel = functools.partial(_embedfc_kernel, approximate_gelu=approximate_gelu)
    out = pl.pallas_call(
        kernel,
        out_shape=jax.ShapeDtypeStruct((padded_packed, n_dim), out_dtype),
        grid=(grid_len,),
        in_specs=[
            pl.BlockSpec((tb, k_dim), lambda i: (i, 0)),      # x   (pipelined)
            # Constant-index operands: DMA'd once, VMEM-resident across the grid.
            pl.BlockSpec((k_dim, n_dim), lambda i: (0, 0)),   # W1
            pl.BlockSpec((1, n_dim), lambda i: (0, 0)),       # b1
            pl.BlockSpec((n_dim, n_dim), lambda i: (0, 0)),   # W2
            pl.BlockSpec((1, n_dim), lambda i: (0, 0)),       # b2
        ],
        out_specs=pl.BlockSpec((tb, n_dim), lambda i: (i, 0)),
        compiler_params=pltpu.CompilerParams(
            dimension_semantics=("parallel",),
            vmem_limit_bytes=vmem_limit_bytes,
        ),
        cost_estimate=cost,
    )(x_packed, w1k, b1k, w2k, b2k)

    out = out.reshape(padded, emb_dim)
    if padded != batch:
        out = out[:batch]
    return out


def init_linear_params(key, fan_in, fan_out):
    """Deterministic init mimicking torch.nn.Linear default (uniform +-1/sqrt(fan_in)).
    Returns W already transposed to (fan_in, fan_out)."""
    kw, kb = jax.random.split(key)
    bound = 1.0 / math.sqrt(fan_in)
    w = jax.random.uniform(kw, (fan_in, fan_out), jnp.float32, -bound, bound)
    b = jax.random.uniform(kb, (fan_out,), jnp.float32, -bound, bound)
    return w, b


if __name__ == "__main__":
    input_dim = 16
    emb_dim = 32

    key = jax.random.PRNGKey(0)
    kx, k1, k2 = jax.random.split(key, 3)

    # Example input: (2, 4, 16, 16) -> view(-1, 16) gives a batch of 128 rows.
    x = jax.random.normal(kx, (2, 4, 16, input_dim), jnp.float32)
    w1, b1 = init_linear_params(k1, input_dim, emb_dim)
    w2, b2 = init_linear_params(k2, emb_dim, emb_dim)

    params = pack_embedfc_params(w1, b1, w2, b2)        # packed once, reused
    out = jax.block_until_ready(embed_fc(x, params))
    assert out.shape == (2 * 4 * 16, emb_dim), out.shape

    # Pure-JAX f32 references.
    x2d = x.reshape(-1, input_dim)
    h = x2d @ w1 + b1
    # (a) matching tanh-approx GELU -> isolates the bf16-matmul error.
    h_tanh = 0.5 * h * (1.0 + jnp.tanh(_SQRT_2_OVER_PI * (h + 0.044715 * h ** 3)))
    ref_tanh = h_tanh @ w2 + b2
    # (b) torch nn.GELU() default (exact erf) -> semantic-fidelity check.
    h_erf = 0.5 * h * (1.0 + lax.erf(h * _INV_SQRT2))
    ref_erf = h_erf @ w2 + b2

    assert jnp.allclose(out, ref_tanh, atol=2e-2, rtol=2e-2), float(
        jnp.max(jnp.abs(out - ref_tanh)))
    assert jnp.allclose(out, ref_erf, atol=3e-2, rtol=3e-2), float(
        jnp.max(jnp.abs(out - ref_erf)))

    print("KERNEL_OK")
</pallas_src>

<mosaic_0001>
module attributes {stable_mosaic.version = 11 : i64} {
  func.func @_embedfc_kernel(%arg0: i32, %arg1: memref<8x128xf32, #tpu.memory_space<vmem>>, %arg2: memref<128x256xbf16, #tpu.memory_space<vmem>>, %arg3: memref<1x256xf32, #tpu.memory_space<vmem>>, %arg4: memref<256x256xbf16, #tpu.memory_space<vmem>>, %arg5: memref<1x256xf32, #tpu.memory_space<vmem>>, %arg6: memref<8x256xf32, #tpu.memory_space<vmem>>) attributes {dimension_semantics = [#tpu.dimension_semantics<parallel>], iteration_bounds = array<i64: 2>, scalar_prefetch = 0 : i64, scratch_operands = 0 : i64, tpu.core_type = #tpu.core_type<tc>, window_params = [{transform_indices = @transform_0, window_bounds = array<i64: 8, 128>}, {pipeline_mode = #tpu.pipeline_mode<synchronous>, transform_indices = @transform_1, window_bounds = array<i64: 128, 256>}, {pipeline_mode = #tpu.pipeline_mode<synchronous>, transform_indices = @transform_2, window_bounds = array<i64: 1, 256>}, {pipeline_mode = #tpu.pipeline_mode<synchronous>, transform_indices = @transform_3, window_bounds = array<i64: 256, 256>}, {pipeline_mode = #tpu.pipeline_mode<synchronous>, transform_indices = @transform_4, window_bounds = array<i64: 1, 256>}, {transform_indices = @transform_5, window_bounds = array<i64: 8, 256>}]} {
    %c0 = arith.constant 0 : index
    %c0_0 = arith.constant 0 : index
    %0 = vector.load %arg1[%c0, %c0_0] : memref<8x128xf32, #tpu.memory_space<vmem>>, vector<8x128xf32>
    %1 = arith.truncf %0 : vector<8x128xf32> to vector<8x128xbf16>
    %c0_1 = arith.constant 0 : index
    %c0_2 = arith.constant 0 : index
    %2 = vector.load %arg2[%c0_1, %c0_2] : memref<128x256xbf16, #tpu.memory_space<vmem>>, vector<128x256xbf16>
    %cst = arith.constant dense<0.000000e+00> : vector<8x256xf32>
    %3 = tpu.matmul %1, %2, %cst {dimension_numbers = #tpu.dot_dimension_numbers<[1], [0], [0], [1], [0, 0, 1, 1], [], []>} : vector<8x128xbf16>, vector<128x256xbf16>, vector<8x256xf32> -> vector<8x256xf32>
    %c0_3 = arith.constant 0 : index
    %c0_4 = arith.constant 0 : index
    %4 = vector.load %arg3[%c0_3, %c0_4] : memref<1x256xf32, #tpu.memory_space<vmem>>, vector<1x256xf32>
    %5 = vector.broadcast %4 : vector<1x256xf32> to vector<8x256xf32>
    %6 = arith.addf %3, %5 : vector<8x256xf32>
    %7 = arith.mulf %6, %6 : vector<8x256xf32>
    %8 = arith.mulf %7, %6 : vector<8x256xf32>
    %cst_5 = arith.constant 4.471500e-02 : f32
    %9 = vector.broadcast %cst_5 : f32 to vector<8x256xf32>
    %10 = arith.mulf %9, %8 : vector<8x256xf32>
    %11 = arith.addf %6, %10 : vector<8x256xf32>
    %cst_6 = arith.constant 0.797884583 : f32
    %12 = vector.broadcast %cst_6 : f32 to vector<8x256xf32>
    %13 = arith.mulf %12, %11 : vector<8x256xf32>
    %cst_7 = arith.constant 5.000000e-01 : f32
    %14 = vector.broadcast %cst_7 : f32 to vector<8x256xf32>
    %15 = arith.mulf %14, %6 : vector<8x256xf32>
    %16 = math.tanh %13 : vector<8x256xf32>
    %cst_8 = arith.constant 1.000000e+00 : f32
    %17 = vector.broadcast %cst_8 : f32 to vector<8x256xf32>
    %18 = arith.addf %17, %16 : vector<8x256xf32>
    %19 = arith.mulf %15, %18 : vector<8x256xf32>
    %20 = arith.truncf %19 : vector<8x256xf32> to vector<8x256xbf16>
    %c0_9 = arith.constant 0 : index
    %c0_10 = arith.constant 0 : index
    %21 = vector.load %arg4[%c0_9, %c0_10] : memref<256x256xbf16, #tpu.memory_space<vmem>>, vector<256x256xbf16>
    %cst_11 = arith.constant dense<0.000000e+00> : vector<8x256xf32>
    %22 = tpu.matmul %20, %21, %cst_11 {dimension_numbers = #tpu.dot_dimension_numbers<[1], [0], [0], [1], [0, 0, 1, 1], [], []>} : vector<8x256xbf16>, vector<256x256xbf16>, vector<8x256xf32> -> vector<8x256xf32>
    %c0_12 = arith.constant 0 : index
    %c0_13 = arith.constant 0 : index
    %23 = vector.load %arg5[%c0_12, %c0_13] : memref<1x256xf32, #tpu.memory_space<vmem>>, vector<1x256xf32>
    %24 = vector.broadcast %23 : vector<1x256xf32> to vector<8x256xf32>
    %25 = arith.addf %22, %24 : vector<8x256xf32>
    %c0_14 = arith.constant 0 : index
    %c0_15 = arith.constant 0 : index
    %26 = vector.load %arg6[%c0_14, %c0_15] : memref<8x256xf32, #tpu.memory_space<vmem>>, vector<8x256xf32>
    tpu.vector_store %arg6[%c0_14, %c0_15], %25 {strides = array<i32>} : memref<8x256xf32, #tpu.memory_space<vmem>>, vector<8x256xf32>,
    return
  }
  func.func @transform_0(%arg0: i32) -> (i32, i32) {
    %c0_i32 = arith.constant 0 : i32
    %c0_i32_0 = arith.constant 0 : i32
    return %arg0, %c0_i32 : i32, i32
  }
  func.func @transform_1(%arg0: i32) -> (i32, i32) {
    %c0_i32 = arith.constant 0 : i32
    %c0_i32_0 = arith.constant 0 : i32
    %c0_i32_1 = arith.constant 0 : i32
    return %c0_i32, %c0_i32_0 : i32, i32
  }
  func.func @transform_2(%arg0: i32) -> (i32, i32) {
    %c0_i32 = arith.constant 0 : i32
    %c0_i32_0 = arith.constant 0 : i32
    %c0_i32_1 = arith.constant 0 : i32
    return %c0_i32, %c0_i32_0 : i32, i32
  }
  func.func @transform_3(%arg0: i32) -> (i32, i32) {
    %c0_i32 = arith.constant 0 : i32
    %c0_i32_0 = arith.constant 0 : i32
    %c0_i32_1 = arith.constant 0 : i32
    return %c0_i32, %c0_i32_0 : i32, i32
  }
  func.func @transform_4(%arg0: i32) -> (i32, i32) {
    %c0_i32 = arith.constant 0 : i32
    %c0_i32_0 = arith.constant 0 : i32
    %c0_i32_1 = arith.constant 0 : i32
    return %c0_i32, %c0_i32_0 : i32, i32
  }
  func.func @transform_5(%arg0: i32) -> (i32, i32) {
    %c0_i32 = arith.constant 0 : i32
    %c0_i32_0 = arith.constant 0 : i32
    return %arg0, %c0_i32 : i32, i32
  }
}

</mosaic_0001>

<bundles_post_ra>
// kernel: tpu_custom_call.1
= control target key start
LH: loop header
LB: loop body
LE: loop exit
PB: predicated region body
PF: predicated region fallthrough
CT: control target
= control target key end

     0   :  { %10 = vsyncpa [#allocation3], 0  ;;  %s1378_s0 = inlined_call_operand.hbm [shape: f32[16,128], index: 0, kind: input, shape index: {}]   ;;  %s1379_s1 = inlined_call_operand.hbm [shape: bf16[128,256], index: 1, kind: input, shape index: {}]   ;;  %s1380_s2 = inlined_call_operand.vmem [shape: f32[1,256], index: 2, kind: input, shape index: {}]   ;;  %s1381_s3 = inlined_call_operand.hbm [shape: bf16[256,256], index: 3, kind: input, shape index: {}]   ;;  %s1382_s4 = inlined_call_operand.vmem [shape: f32[1,256], index: 4, kind: input, shape index: {}]   ;;  %s1383_s5 = inlined_call_operand.hbm [shape: f32[16,256], index: 5, kind: output, shape index: {}]  }
   0x1   :  { %12 = vsyncpa [#allocation3 + $0x1], 0 }
   0x2   :  { %13 = vsyncpa [#allocation6], 0 }
   0x3   :  { %14 = vsyncpa [#allocation4], 0 }
   0x4   :  { %16 = vsyncpa [#allocation4 + $0x1], 0  ;;  %s1191_s18 = smov 0   ;;  %s1193_s19 = smov 0  }
   0x5   :  { %s1195_s20 = smov 0   ;;  %s1197_s21 = smov 0  }
   0x6 LB: > { %s1212_s22 = sadd.s32 4294967295, %s1152_s21   ;;  %s792_s23 = sadd.s32 4294967294, %s1152_s21   ;;  %s1152_s21 = sphi %s1197_s21, %s1405_s21   ;;  %s1148_s20 = sphi %s1195_s20, %s1404_s20   ;;  %s1144_s19 = sphi %s1193_s19, %s1403_s19   ;;  %s1140_s18 = sphi %s1191_s18, %s1402_s18  }
   0x7   : > { %p42_p0 = scmp.ne.s32.totalorder %s1144_s19, %s1140_s18  ;;  %p1384_p1 = scmp.eq.s32.totalorder %s1212_s22, 0 }
   0x8   : > { %p156_p3 = scmp.eq.s32.totalorder %s792_s23, 1  ;;  %p793_p5 = scmp.ge.s32.totalorder %s1152_s21, 1 }
   0x9   : > { %p1221_p4 = por %p1384_p1, %p42_p0  ;;  %p163_p7 = scmp.lt.s32.totalorder %s1152_s21, 3 }
   0xa   : > { %p1226_p6 = por %p156_p3, %p42_p0  ;;  %s1154_s27 = smov [#allocation5]  }
   0xb   : > { %s1388_s24 = scalar_select %p1221_p4, 1, 0 }
   0xc   : > { %s1389_s25 = scalar_select %p1226_p6, 1, 0 }
   0xd   : > { %p1231_p8 = pnand %p793_p5, %p163_p7  ;;  %s175_s28 = sshll.u32 %s1154_s27, 4  ;;  %s176_s28 = int_to_ptr.vmem [resolvable:$true] %s175_s28 }
   0xe   : > { %s1155_s30 = smov [#allocation7]   ;;  %s1015_s7 = scalar_lea.vmem %s176_s28, 2048 }
   0xf   : > { %s1390_s26 = scalar_select %p1231_p8, 1, 0 }
  0x10   : > { %p870_p9 = pneg %p1231_p8  ;;  %s191_s6 = sshll.u32 %s1155_s30, 4  ;;  %s192_s6 = int_to_ptr.vmem [resolvable:$true] %s191_s6 }
  0x11   : > { %p1016_p13 = scmp.ne.s32.totalorder %s176_s28, %s1015_s7  ;;  %p1023_p5 = scmp.lt.s32.totalorder %s176_s28, %s176_s28 }
  0x12   : > { %p1240_p11 = pnand %p870_p9, %p1384_p1  ;;  %p1024_p7 = scmp.lt.s32.totalorder %s1015_s7, %s1015_s7 }
  0x14   : > { %p1006_p12 = pneg %p1240_p11  ;;  %p1025_p10 = por %p1024_p7, %p1023_p5 }
  0x16   : > { %p1018_p0 = pnand %p1016_p13, %p1006_p12 }
  0x18   : > { %p1019_p3 = pneg %p1018_p0 }
  0x1a   : > { %p1026_p9 = pnand %p1025_p10, %p1019_p3 }
  0x1c   : > { %1029 = shalt.err (!%p1026_p9)
}
  0x1d   : > { %s1156_s8 = smov 128   ;;  %s1157_s9 = smov 8  }
  0x1e   : > { %873 = dma.hbm_to_vmem [thread:$0]  (!%p1240_p11), %s1379_s1, 2048, %s176_s28, [#allocation6], %s1156_s8, %s1156_s8, %s1157_s9  }
  0x1f   : > { %s1041_s12 = scalar_lea.vmem %s192_s6, 4096  ;;  %p1049_p2 = scmp.lt.s32.totalorder %s192_s6, %s192_s6 }
  0x20   : > { %p1042_p1 = scmp.ne.s32.totalorder %s192_s6, %s1041_s12  ;;  %p1050_p6 = scmp.lt.s32.totalorder %s1041_s12, %s1041_s12 }
  0x22   : > { %p1044_p13 = pnand %p1042_p1, %p1006_p12  ;;  %p1051_p5 = por %p1050_p6, %p1049_p2 }
  0x24   : > { %p1045_p0 = pneg %p1044_p13 }
  0x26   : > { %p1052_p10 = pnand %p1051_p5, %p1045_p0 }
  0x28   : > { %1055 = shalt.err (!%p1052_p10)
}
  0x29   : > { %876 = dma.hbm_to_vmem [thread:$0]  (!%p1240_p11), %s1381_s3, 4096, %s192_s6, [#allocation6], %s1156_s8, %s1156_s8, %s1157_s9  }
  0x2a   : > { %s1263_s15 = sadd.s32 1, %s1152_s21   ;;  %s29_s16 = sadd.s32 1, %s1148_s20 }
  0x2b   : > { %s26_s17 = ssub.s32 %s1152_s21, %s1263_s15  ;;  %p36_p1 = scmp.ne.s32.totalorder %s1148_s20, %s1144_s19 }
  0x2c   : > { %p27_p2 = scmp.eq.s32.totalorder %s26_s17, 0  ;;  %p37_p6 = scmp.eq.s32.totalorder %s1152_s21, 0 }
  0x2d   : > { %p1392_p12 = scmp.eq.s32.totalorder %s1212_s22, 1  ;;  %p887_p7 = scmp.lt.s32.totalorder %s1152_s21, 2 }
  0x2e   : > { %s1279_s27 = scalar_select %p27_p2, %s1148_s20, %s29_s16  }
  0x2f   : > { %p1273_p3 = por %p1392_p12, %p36_p1  ;;  %p38_p9 = por %p37_p6, %p36_p1 }
  0x30   : > { %s208_s28 = sand.u32 1, %s1148_s20   ;;  %s798_s30 = sshll.u32 %s1152_s21, 7 }
  0x31   : > { %s1393_s23 = scalar_select %p1273_p3, 1, 0 }
  0x32   : > { %s797_s29 = sshll.u32 %s208_s28, 3  ;;  %s1286_s8 = scalar_lea.hbm %s1378_s0, %s798_s30 }
  0x33   : > { %s212_s9 = scalar_lea.vmem [#allocation2], %s797_s29  ;;  %p1288_p11 = pnand %p887_p7, %p38_p9 }
  0x34   : > { %s219_s10 = sshll.u32 %s212_s9, 4  ;;  %s209_s12 = scalar_lea.sflag [#allocation3], %s208_s28  ;;  %s220_s10 = int_to_ptr.vmem [resolvable:$true] %s219_s10 }
  0x35   : > { %s1056_s13 = scalar_lea.hbm %s1286_s8, 128  ;;  %p1058_p0 = pneg %p1288_p11 }
  0x36   : > { %p1057_p13 = scmp.ne.s32.totalorder %s1286_s8, %s1056_s13  ;;  %s1061_s17 = scalar_lea.hbm %s1378_s0, 256 }
  0x37   : > { %p1062_p1 = scmp.lt.s32.totalorder %s1286_s8, %s1378_s0  ;;  %p1063_p2 = scmp.lt.s32.totalorder %s1061_s17, %s1056_s13 }
  0x38   : > { %p1059_p5 = pnand %p1058_p0, %p1057_p13 }
  0x39   : > { %p1064_p6 = por %p1063_p2, %p1062_p1 }
  0x3a   : > { %p1060_p10 = pneg %p1059_p5 }
  0x3c   : > { %p1065_p12 = pnand %p1064_p6, %p1060_p10 }
  0x3e   : > { %1068 = shalt.err (!%p1065_p12)
}
  0x3f   : > { %s1069_s6 = scalar_lea.vmem %s220_s10, 128  ;;  %s1158_s28 = smov [#allocation2]  }
  0x40   : > { %p1070_p7 = scmp.ne.s32.totalorder %s220_s10, %s1069_s6  ;;  %s1074_s7 = sshll.u32 %s1158_s28, 4  ;;  %s1075_s7 = int_to_ptr.vmem [resolvable:$false] %s1074_s7 }
  0x41   : > { %s1076_s9 = scalar_lea.vmem %s1075_s7, 256  ;;  %p1077_p13 = scmp.lt.s32.totalorder %s220_s10, %s1075_s7 }
  0x42   : > { %p1072_p9 = pnand %p1070_p7, %p1058_p0  ;;  %p1078_p5 = scmp.lt.s32.totalorder %s1076_s9, %s1069_s6 }
  0x44   : > { %p1073_p3 = pneg %p1072_p9  ;;  %p1079_p4 = por %p1078_p5, %p1077_p13 }
  0x46   : > { %p1080_p8 = pnand %p1079_p4, %p1073_p3 }
  0x48   : > { %1083 = shalt.err (!%p1080_p8)
}
  0x49   : > { %880 = dma.hbm_to_vmem [thread:$0]  (!%p1288_p11), %s1286_s8, 128, %s220_s10, %s209_s12  }
  0x4a   : > { %p1395_p10 = scmp.ne.s32.totalorder %s1390_s26, 0 }
  0x4b   : > { %s1309_s13 = sand.u32 (!%p1395_p10), 1, %s1144_s19   ;;  %p1396_p0 = scmp.ne.s32.totalorder (!%p1395_p10), %s1388_s24, 0 }
  0x4c   : > { %228 = sbr.rel (%p1395_p10) target bundleno = 557 (0x22d), region = 40  ;;  %s800_s14 = sshll.u32 (!%p1395_p10), %s1309_s13, 3 }
  0x4d   : > { %s231_s16 = scalar_lea.sflag (!%p1395_p10), [#allocation3], %s1309_s13  ;;  %s1313_s17 = scalar_lea.vmem (!%p1395_p10), [#allocation2], %s800_s14 }
  0x51   : > { %1127 = dma.done.wait (%p1396_p0), %s231_s16, 128  }
  0x52   : > { %1129 = vsyncadd (%p1396_p0), %s231_s16, 4294967168  ;;  %p1397_p4 = scmp.eq.s32.totalorder %s1212_s22, 0 }
  0x54   : > { %1131 = dma.done.wait (%p1397_p4), [#allocation6], 6144   ;;  %p1398_p8 = pmov %p1397_p4 }
  0x55   : > { %v1159_v0 = vmov 0   ;;  %v928_v1 = vld [vmem:[#allocation5 + $0x74] ss:$8 sps:$4 sm:$0xff]   ;;  %v930_v2 = vld [vmem:[#allocation5 + $0x70] ss:$8 sps:$4 sm:$0xff]   ;;  %v290_v51 = vlaneseq  ;;  %s803_s8 = sshll.u32 %s1309_s13, 4 }
  0x56   : > { %1133 = vsyncadd (%p1398_p8), [#allocation6], 4294961152  ;;  %412 = vmatprep.mubr.bf16.mxu0 %v1159_v0  ;;  %380 = vmatprep.subr.bf16.mxu0 %v928_v1  ;;  %v931_v3 = vld [vmem:[#allocation5 + $0x64] ss:$8 sps:$4 sm:$0xff]   ;;  %v933_v4 = vld [vmem:[#allocation5 + $0x60] ss:$8 sps:$4 sm:$0xff]  }
  0x57   : > { %381 = vmatpush1.bf16.msra.mxu0 %v930_v2  ;;  %v934_v5 = vld [vmem:[#allocation5 + $0x54] ss:$8 sps:$4 sm:$0xff]   ;;  %v936_v6 = vld [vmem:[#allocation5 + $0x50] ss:$8 sps:$4 sm:$0xff]   ;;  %v937_v7 = vld [vmem:[#allocation5 + $0x44] ss:$8 sps:$4 sm:$0xff]  }
  0x58   : > { %382 = vmatprep.subr.bf16.mxu0 %v931_v3  ;;  %v939_v8 = vld [vmem:[#allocation5 + $0x40] ss:$8 sps:$4 sm:$0xff]   ;;  %v940_v9 = vld [vmem:[#allocation5 + $0x34] ss:$8 sps:$4 sm:$0xff]   ;;  %v954_v11 = vld [vmem:[#allocation7 + $0x70] ss:$8 sps:$4 sm:$0xff]  }
  0x59   : > { %v952_v10 = vld [vmem:[#allocation7 + $0x74] ss:$8 sps:$4 sm:$0xff]   ;;  %v955_v12 = vld [vmem:[#allocation7 + $0x64] ss:$8 sps:$4 sm:$0xff]   ;;  %v942_v13 = vld [vmem:[#allocation5 + $0x30] ss:$8 sps:$4 sm:$0xff]  }
  0x5a   : > { %645 = vmatprep.subr.bf16.mxu1 %v952_v10  ;;  %v957_v14 = vld [vmem:[#allocation7 + $0x60] ss:$8 sps:$4 sm:$0xff]   ;;  %v958_v15 = vld [vmem:[#allocation7 + $0x54] ss:$8 sps:$4 sm:$0xff]   ;;  %v943_v16 = vld [vmem:[#allocation5 + $0x24] ss:$8 sps:$4 sm:$0xff]  }
  0x5b   : > { %383 = vmatpush1.bf16.msra.mxu0 %v933_v4  ;;  %646 = vmatpush1.bf16.msra.mxu1 %v954_v11  ;;  %v945_v17 = vld [vmem:[#allocation5 + $0x20] ss:$8 sps:$4 sm:$0xff]   ;;  %v960_v18 = vld [vmem:[#allocation7 + $0x50] ss:$8 sps:$4 sm:$0xff]   ;;  %v961_v19 = vld [vmem:[#allocation7 + $0x44] ss:$8 sps:$4 sm:$0xff]  }
  0x5c   : > { %384 = vmatprep.subr.bf16.mxu0 %v934_v5  ;;  %647 = vmatprep.subr.bf16.mxu1 %v955_v12  ;;  %v946_v20 = vld [vmem:[#allocation5 + $0x14] ss:$8 sps:$4 sm:$0xff]   ;;  %v963_v21 = vld [vmem:[#allocation7 + $0x40] ss:$8 sps:$4 sm:$0xff]   ;;  %v948_v22 = vld [vmem:[#allocation5 + $0x10] ss:$8 sps:$4 sm:$0xff]  }
  0x5d   : > { %v964_v23 = vld [vmem:[#allocation7 + $0x34] ss:$8 sps:$4 sm:$0xff]   ;;  %v949_v24 = vld [vmem:[#allocation5 + $0x4] ss:$8 sps:$4 sm:$0xff]   ;;  %v966_v25 = vld [vmem:[#allocation7 + $0x30] ss:$8 sps:$4 sm:$0xff]  }
  0x5e   : > { %v951_v26 = vld [vmem:[#allocation5] ss:$8 sps:$4 sm:$0xff]   ;;  %v270_v27 = vld [vmem:[%s1313_s17] sm:$0xff]  ;;  %v967_v28 = vld [vmem:[#allocation7 + $0x24] ss:$8 sps:$4 sm:$0xff]   ;;  %v291_v52 = vshrl.u32 %v290_v51, 7 }
  0x5f   : > { %385 = vmatpush1.bf16.msra.mxu0 %v936_v6  ;;  %648 = vmatpush1.bf16.msra.mxu1 %v957_v14  ;;  %v271_v29 = vpack.c.bf16 %v270_v27, %v270_v27  ;;  %v969_v30 = vld [vmem:[#allocation7 + $0x20] ss:$8 sps:$4 sm:$0xff]   ;;  %v970_v31 = vld [vmem:[#allocation7 + $0x14] ss:$8 sps:$4 sm:$0xff]   ;;  %v972_v32 = vld [vmem:[#allocation7 + $0x10] ss:$8 sps:$4 sm:$0xff]  }
  0x60   : > { %386 = vmatprep.subr.bf16.mxu0 %v937_v7  ;;  %649 = vmatprep.subr.bf16.mxu1 %v958_v15  ;;  %v973_v33 = vld [vmem:[#allocation7 + $0x4] ss:$8 sps:$4 sm:$0xff]   ;;  %v975_v34 = vld [vmem:[#allocation7] ss:$8 sps:$4 sm:$0xff]   ;;  %v976_v35 = vld [vmem:[#allocation7 + $0xf4] ss:$8 sps:$4 sm:$0xff]  }
  0x61   : > { %v978_v36 = vld [vmem:[#allocation7 + $0xf0] ss:$8 sps:$4 sm:$0xff]   ;;  %v979_v37 = vld [vmem:[#allocation7 + $0xe4] ss:$8 sps:$4 sm:$0xff]   ;;  %v981_v38 = vld [vmem:[#allocation7 + $0xe0] ss:$8 sps:$4 sm:$0xff]  }
  0x62   : > { %v982_v39 = vld [vmem:[#allocation7 + $0xd4] ss:$8 sps:$4 sm:$0xff]   ;;  %v984_v40 = vld [vmem:[#allocation7 + $0xd0] ss:$8 sps:$4 sm:$0xff]   ;;  %v985_v41 = vld [vmem:[#allocation7 + $0xc4] ss:$8 sps:$4 sm:$0xff]  }
  0x63   : > { %387 = vmatpush1.bf16.msra.mxu0 %v939_v8  ;;  %650 = vmatpush1.bf16.msra.mxu1 %v960_v18  ;;  %v987_v42 = vld [vmem:[#allocation7 + $0xc0] ss:$8 sps:$4 sm:$0xff]   ;;  %v988_v43 = vld [vmem:[#allocation7 + $0xb4] ss:$8 sps:$4 sm:$0xff]   ;;  %v990_v44 = vld [vmem:[#allocation7 + $0xb0] ss:$8 sps:$4 sm:$0xff]  }
  0x64   : > { %388 = vmatprep.subr.bf16.mxu0 %v940_v9  ;;  %651 = vmatprep.subr.bf16.mxu1 %v961_v19  ;;  %v991_v45 = vld [vmem:[#allocation7 + $0xa4] ss:$8 sps:$4 sm:$0xff]   ;;  %v993_v46 = vld [vmem:[#allocation7 + $0xa0] ss:$8 sps:$4 sm:$0xff]   ;;  %v994_v47 = vld [vmem:[#allocation7 + $0x94] ss:$8 sps:$4 sm:$0xff]  }
  0x65   : > { %v996_v48 = vld [vmem:[#allocation7 + $0x90] ss:$8 sps:$4 sm:$0xff]   ;;  %v997_v49 = vld [vmem:[#allocation7 + $0x84] ss:$8 sps:$4 sm:$0xff]   ;;  %v999_v50 = vld [vmem:[#allocation7 + $0x80] ss:$8 sps:$4 sm:$0xff]  }
  0x66   : > { %v292_v53 = vsub.s32 0, %v291_v52  ;;  %v288_v54 = vld [vmem:[%s1380_s2] sm:$0x3]  ;;  %v296_v55 = vsub.s32 1, %v291_v52  ;;  %s857_s12 = sshll.u32 %s1212_s22, 8  ;;  %s268_s30 = scalar_lea.vmem [#allocation8], %s803_s8 }
  0x67   : > { %389 = vmatpush1.bf16.msra.mxu0 %v942_v13  ;;  %652 = vmatpush1.bf16.msra.mxu1 %v963_v21  ;;  %s703_s29 = sshll.u32 %s268_s30, 4  ;;  %s1335_s7 = scalar_lea.hbm %s1383_s5, %s857_s12  ;;  %s1337_s29 = int_to_ptr.vmem [resolvable:$true] %s703_s29 }
  0x68   : > { %390 = vmatprep.subr.bf16.mxu0 %v943_v16  ;;  %653 = vmatprep.subr.bf16.mxu1 %v964_v23  ;;  %v293_v56 = vrot.slane %v288_v54, %v292_v53  ;;  %v297_v57 = vrot.slane %v288_v54, %v296_v55  ;;  %s689_s22 = scalar_lea.sflag [#allocation4], %s1309_s13  ;;  %s1084_s9 = scalar_lea.vmem %s1337_s29, 256 }
  0x69   : > { %p1085_p3 = scmp.ne.s32.totalorder %s1337_s29, %s1084_s9  ;;  %p1399_p11 = scmp.ne.s32.totalorder %s1393_s23, 0 }
  0x6a   : > { %s1160_s14 = smov [#allocation8]  }
  0x6b   : > { %391 = vmatpush1.bf16.msra.mxu0 %v945_v17  ;;  %654 = vmatpush1.bf16.msra.mxu1 %v966_v25  ;;  %p1086_p1 = pnand %p1085_p3, %p1399_p11  ;;  %s1088_s16 = sshll.u32 %s1160_s14, 4  ;;  %s1089_s16 = int_to_ptr.vmem [resolvable:$false] %s1088_s16 }
  0x6c   : > { %392 = vmatprep.subr.bf16.mxu0 %v946_v20  ;;  %655 = vmatprep.subr.bf16.mxu1 %v967_v28  ;;  %v473_v20 = vld [vmem:[%s1382_s4] sm:$0x3]  ;;  %s1090_s17 = scalar_lea.vmem %s1089_s16, 512  ;;  %p1091_p6 = scmp.lt.s32.totalorder %s1337_s29, %s1089_s16 }
  0x6d   : > { %v478_v21 = vrot.slane %v473_v20, %v292_v53  ;;  %p1087_p2 = pneg %p1086_p1  ;;  %p1092_p12 = scmp.lt.s32.totalorder %s1090_s17, %s1084_s9 }
  0x6f   : > { %393 = vmatpush1.bf16.msra.mxu0 %v948_v22  ;;  %656 = vmatpush1.bf16.msra.mxu1 %v969_v30  ;;  %v482_v22 = vrot.slane %v473_v20, %v296_v55  ;;  %p1093_p7 = por %p1092_p12, %p1091_p6 }
  0x70   : > { %394 = vmatprep.subr.bf16.mxu0 %v949_v24  ;;  %657 = vmatprep.subr.bf16.mxu1 %v970_v31 }
  0x71   : > { %p1094_p9 = pnand %p1093_p7, %p1087_p2 }
  0x73   : > { %395 = vmatpush1.bf16.msra.mxu0 %v951_v26  ;;  %658 = vmatpush1.bf16.msra.mxu1 %v972_v32 }
  0x74   : > { %659 = vmatprep.subr.bf16.mxu1 %v973_v33 }
  0x76   : > { %413 = vmatmul.mubr.bf16.vlgmr.msra.gmra.mxu0 %v271_v29 }
  0x77   : > { %660 = vmatpush1.bf16.msra.mxu1 %v975_v34 }
  0x78   : > { %661 = vmatprep.subr.bf16.mxu1 %v976_v35 }
  0x7b   : > { %662 = vmatpush2.bf16.msra.mxu1 %v978_v36 }
  0x7c   : > { %663 = vmatprep.subr.bf16.mxu1 %v979_v37 }
  0x7f   : > { %664 = vmatpush2.bf16.msra.mxu1 %v981_v38 }
  0x80   : > { %665 = vmatprep.subr.bf16.mxu1 %v982_v39 }
  0x83   : > { %666 = vmatpush2.bf16.msra.mxu1 %v984_v40 }
  0x84   : > { %667 = vmatprep.subr.bf16.mxu1 %v985_v41 }
  0x87   : > { %668 = vmatpush2.bf16.msra.mxu1 %v987_v42 }
  0x88   : > { %669 = vmatprep.subr.bf16.mxu1 %v988_v43 }
  0x8b   : > { %670 = vmatpush2.bf16.msra.mxu1 %v990_v44 }
  0x8c   : > { %671 = vmatprep.subr.bf16.mxu1 %v991_v45 }
  0x8f   : > { %672 = vmatpush2.bf16.msra.mxu1 %v993_v46 }
  0x90   : > { %673 = vmatprep.subr.bf16.mxu1 %v994_v47 }
  0x93   : > { %674 = vmatpush2.bf16.msra.mxu1 %v996_v48 }
  0x94   : > { %675 = vmatprep.subr.bf16.mxu1 %v997_v49 }
  0x97   : > { %676 = vmatpush2.bf16.msra.mxu1 %v999_v50 }
 0x136   : > { %v414_v58 = vpop.f32.mrf.mxu0 }
 0x137   : > { %v415_v59 = vadd.f32 %v414_v58, %v293_v56 }
 0x138   : > { %v416_v60 = vpop.f32.mrf.mxu0 }
 0x139   : > { %v421_v61 = vmul.f32 %v415_v59, %v415_v59  ;;  %v417_v62 = vadd.f32 %v416_v60, %v297_v57  ;;  %v431_v13 = vmul.f32 0.5, %v415_v59 }
 0x13a   : > { %v418_v63 = vpop.f32.mrf.mxu0 }
 0x13b   : > { %v423_v0 = vmul.f32 %v421_v61, %v415_v59  ;;  %v422_v1 = vmul.f32 %v417_v62, %v417_v62  ;;  %v432_v14 = vmul.f32 0.5, %v417_v62 }
 0x13c   : > { %v419_v2 = vpop.f32.mrf.mxu0 }
 0x13d   : > { %v425_v3 = vmul.f32 0.044715, %v423_v0  ;;  %v424_v4 = vmul.f32 %v422_v1, %v417_v62 }
 0x13f   : > { %v427_v5 = vadd.f32 %v425_v3, %v415_v59  ;;  %v426_v6 = vmul.f32 0.044715, %v424_v4 }
 0x141   : > { %v429_v7 = vmul.f32 0.7978846, %v427_v5  ;;  %v428_v8 = vadd.f32 %v426_v6, %v417_v62 }
 0x143   : > { %1000 = vtanh.f32 %v429_v7  ;;  %v430_v9 = vmul.f32 0.7978846, %v428_v8 }
 0x145   : > { %1002 = vtanh.f32 %v430_v9 }
 0x150   : > { %v1001_v10 = vpop.eup %1000 }
 0x151   : > { %v435_v11 = vadd.f32 1.0, %v1001_v10 }
 0x152   : > { %v1003_v12 = vpop.eup %1002 }
 0x153   : > { %v436_v15 = vadd.f32 1.0, %v1003_v12  ;;  %v437_v16 = vmul.f32 %v435_v11, %v431_v13 }
 0x155   : > { %v438_v17 = vmul.f32 %v436_v15, %v432_v14  ;;  %v439_v19 = vpack.c.bf16 %v437_v16, %v437_v16 }
 0x157   : > { %v440_v18 = vpack.c.bf16 %v438_v17, %v438_v17 }
 0x159   : > { %677 = vmatprep.mubr.bf16.mxu1 %v440_v18 }
 0x15a   : > { %678 = vmatmul.mubr.bf16.vlgmr.msra.gmra.mxu1 %v439_v19 }
 0x21a   : > { %v679_v23 = vpop.f32.mrf.mxu1 }
 0x21b   : > { %v680_v24 = vadd.f32 %v679_v23, %v478_v21 }
 0x21c   : > { %v681_v25 = vpop.f32.mrf.mxu1 }
 0x21d   : > { %686 = vst [vmem:[%s268_s30] sm:$0xff] %v680_v24  ;;  %v682_v26 = vadd.f32 %v681_v25, %v482_v22 }
 0x21e   : > { %v683_v27 = vpop.f32.mrf.mxu1 }
 0x21f   : > { %687 = vst [vmem:[%s268_s30 + $0x8] sm:$0xff] %v682_v26 }
 0x220   : > { %v684_v28 = vpop.f32.mrf.mxu1 }
 0x221   : > { %1097 = shalt.err (!%p1094_p9)
}
 0x222   : > { %s1098_s24 = scalar_lea.hbm %s1335_s7, 256  ;;  %s1102_s8 = scalar_lea.hbm %s1383_s5, 512 }
 0x223   : > { %p1099_p13 = scmp.ne.s32.totalorder %s1335_s7, %s1098_s24  ;;  %p1103_p0 = scmp.lt.s32.totalorder %s1335_s7, %s1383_s5 }
 0x224   : > { %p1104_p4 = scmp.lt.s32.totalorder %s1102_s8, %s1098_s24 }
 0x225   : > { %p1100_p5 = pnand %p1099_p13, %p1399_p11 }
 0x226   : > { %p1105_p8 = por %p1104_p4, %p1103_p0 }
 0x227   : > { %p1101_p10 = pneg %p1100_p5 }
 0x229   : > { %p1106_p3 = pnand %p1105_p8, %p1101_p10 }
 0x22b   : > { %1109 = shalt.err (!%p1106_p3)
}
 0x22c   : > { %868 = dma.vmem_to_hbm [thread:$0]  (%p1399_p11), %s1337_s29, 256, %s1335_s7, %s689_s22  }
 0x22d PF: > { %s715_s12 = sand.u32 1, %s1140_s18   ;;  %p1400_p1 = scmp.ne.s32.totalorder %s1389_s25, 0 }
 0x22e   : > { %p1401_p2 = scmp.ge.s32.totalorder %s1152_s21, 2  ;;  %s716_s30 = scalar_lea.sflag [#allocation4], %s715_s12 }
 0x230   : > { %p882_p6 = pnand %p1401_p2, %p1400_p1 }
 0x232   : > { %p883_p12 = pneg %p882_p6 }
 0x234   : > { %1135 = dma.done.wait (%p883_p12), %s716_s30, 256  }
 0x235   : > { %1137 = vsyncadd (%p883_p12), %s716_s30, 4294967040  ;;  %p19_p7 = scmp.ge.s32.totalorder %s1263_s15, 4   ;;  %s1402_s18 = smov %s1144_s19 }
 0x236   : > { %s1403_s19 = smov %s1148_s20  ;;  %s1404_s20 = smov %s1279_s27 }
 0x237   : > { %s1405_s21 = smov %s1263_s15  ;;  %21 = sbr.rel (!%p19_p7) target bundleno = 6 (0x6), region = 93 }
 0x23c   :  { %721 = vsyncpa [#allocation3], 1 }
 0x23d   :  { %723 = vsyncpa [#allocation3 + $0x1], 1 }
 0x23e   :  { %724 = vsyncpa [#allocation6], 1 }
 0x23f   :  { %725 = vsyncpa [#allocation4], 1 }
 0x240   :  { %727 = vsyncpa [#allocation4 + $0x1], 1 }

</bundles_post_ra>
